<compile_context>
chip_gen: v7x
topology: tpu7x:2x2x1
jax: 0.10.0
libtpu: 0.0.40
codegen_flags: <defaults>
</compile_context>

<pallas_src>
import functools

import jax
import jax.numpy as jnp
from jax.experimental import pallas as pl
from jax.experimental.pallas import tpu as pltpu

_HIGHEST = jax.lax.Precision.HIGHEST


def _ca_kernel(x_ref, ih_ref, iw_ref, eh_ref, ew_ref, w1_ref, b1_ref,
               wh_ref, bh_ref, ww_ref, bw_ref, out_ref):
    """CABlock forward for one (nb*C, H*W) slab of images.

    x_ref/out_ref : (nb*C, H*W) in the I/O dtype.
    ih/iw         : (HW, H) / (HW, W) 0/1 pooling indicators (bf16).
    eh/ew         : (H, HW) / (W, HW) 0/1 broadcast-back indicators (bf16).
    w1/b1         : conv1 with eval-mode BN folded (f32).  wh/bh, ww/bw: conv_h/w.
    """
    f32, bf16 = jnp.float32, jnp.bfloat16
    mip, c = w1_ref.shape
    oup = wh_ref.shape[0]
    h = eh_ref.shape[0]
    w = ew_ref.shape[0]
    nbc = x_ref.shape[0]
    nb = nbc // c

    def exact_dot(a_f32, b_01, skip_lo=False):
        # Near-f32-exact matmul against a 0/1-valued bf16 matrix using a hi/lo
        # bf16 split and two single-pass MXU matmuls (instead of HIGHEST
        # multi-pass emulation).
        a_hi = a_f32.astype(bf16)
        out = jnp.dot(a_hi, b_01, preferred_element_type=f32)
        if not skip_lo:
            a_lo = (a_f32 - a_hi.astype(f32)).astype(bf16)
            out = out + jnp.dot(a_lo, b_01, preferred_element_type=f32)
        return out

    x_is_bf16 = jnp.dtype(x_ref.dtype) == jnp.dtype(bf16)
    x_f = x_ref[...].astype(f32)                     # no-op for f32 inputs

    # --- coordinate pooling: one fused slab matmul per axis (all images) ----
    pooled_h = exact_dot(x_f, ih_ref[...], skip_lo=x_is_bf16) * (1.0 / w)  # (nb*C, H)
    pooled_w = exact_dot(x_f, iw_ref[...], skip_lo=x_is_bf16) * (1.0 / h)  # (nb*C, W)

    # --- tiny per-image conv chain on (H+W)-long descriptors ----------------
    # nb*(C+mip+oup)*(H+W) MACs << C*HW slab work above, so this static unroll
    # is negligible; it avoids in-kernel retiling reshapes / batched dots.
    w1 = w1_ref[...]
    b1 = b1_ref[...]
    wh = wh_ref[...]
    bh = bh_ref[...]
    ww = ww_ref[...]
    bw = bw_ref[...]

    def hswish(z):
        return z * (jnp.clip(z + 3.0, 0.0, 6.0) * (1.0 / 6.0))

    gh_parts, gw_parts = [], []
    for b in range(nb):
        ph_b = pooled_h[b * c:(b + 1) * c, :]        # (C, H) f32
        pw_b = pooled_w[b * c:(b + 1) * c, :]        # (C, W) f32
        zh = hswish(jnp.dot(w1, ph_b, precision=_HIGHEST,
                            preferred_element_type=f32) + b1)
        zw = hswish(jnp.dot(w1, pw_b, precision=_HIGHEST,
                            preferred_element_type=f32) + b1)
        gh_parts.append(jax.nn.sigmoid(
            jnp.dot(wh, zh, precision=_HIGHEST, preferred_element_type=f32) + bh))
        gw_parts.append(jax.nn.sigmoid(
            jnp.dot(ww, zw, precision=_HIGHEST, preferred_element_type=f32) + bw))
    g_h = jnp.concatenate(gh_parts, axis=0) if nb > 1 else gh_parts[0]  # (nb*C, H)
    g_w = jnp.concatenate(gw_parts, axis=0) if nb > 1 else gw_parts[0]  # (nb*C, W)

    # --- broadcast gates back over full maps (0/1 matmuls) + fused apply ----
    a_h = exact_dot(g_h, eh_ref[...])                # (nb*C, HW) f32
    a_w = exact_dot(g_w, ew_ref[...])                # (nb*C, HW) f32
    out_ref[...] = (x_f * a_h * a_w).astype(out_ref.dtype)


@functools.partial(jax.jit, static_argnames=("eps",))
def ca_block(x, w1, b1, gamma, beta, run_mean, run_var, wh, bh, ww, bw, eps=1e-5):
    """CABlock forward. x: (N, C, H, W). Requires oup == C (elementwise gate)."""
    n, c, h, w = x.shape
    hw = h * w
    mip = w1.shape[0]
    oup = wh.shape[0]
    assert oup == c, "CABlock elementwise product requires oup == inp"

    dt = x.dtype
    itemsize = jnp.dtype(dt).itemsize

    # --- fold eval-mode BatchNorm into conv1 (plain JAX glue) ---------------
    s = gamma / jnp.sqrt(run_var + eps)
    w1_eff = (w1 * s[:, None]).astype(jnp.float32)            # (mip, C)
    b1_eff = (((b1 - run_mean) * s) + beta)[:, None].astype(jnp.float32)
    wh_f = wh.astype(jnp.float32)
    ww_f = ww.astype(jnp.float32)
    bh2 = bh[:, None].astype(jnp.float32)                     # (oup, 1)
    bw2 = bw[:, None].astype(jnp.float32)                     # (oup, 1)

    # --- 0/1 indicator constants (bf16-exact; 1/H, 1/W applied in-kernel) ---
    row_id = jnp.arange(hw, dtype=jnp.int32) // w
    col_id = jnp.arange(hw, dtype=jnp.int32) % w
    ih = (row_id[:, None] == jnp.arange(h)[None, :]).astype(jnp.bfloat16)   # (hw, h)
    iw = (col_id[:, None] == jnp.arange(w)[None, :]).astype(jnp.bfloat16)   # (hw, w)
    e_h = (jnp.arange(h)[:, None] == row_id[None, :]).astype(jnp.bfloat16)  # (h, hw)
    e_w = (jnp.arange(w)[:, None] == col_id[None, :]).astype(jnp.bfloat16)  # (w, hw)

    # --- sublane/lane-dense I/O layout: (N*C, H*W) (free contiguous reshape)
    x2 = x.reshape(n * c, hw)

    # --- generation-gated VMEM ceiling (v7x has 64 MiB per TensorCore) ------
    ceiling = 48 * 1024 * 1024
    try:
        kind = jax.devices()[0].device_kind.lower()
        if any(t in kind for t in ("v2", "v3", "v4", "v5", "v6")):
            ceiling = 96 * 1024 * 1024                # 128 MiB-VMEM generations
    except Exception:
        pass

    def est(d):  # VMEM bytes for a block of d images, incl. ~25% headroom
        e = d * c * hw
        io = 4 * e * itemsize                         # in + out, double-buffered
        consts = 2 * (2 * hw * (h + w) * 2
                      + (mip * c + 2 * oup * mip + mip + 2 * oup) * 4)
        tmp = 20 * e + 24 * d * (c + mip + oup) * (h + w)
        return (io + consts + tmp) * 5 // 4

    # --- images per block: biggest block that fits the ceiling --------------
    # (cap the per-image conv-chain unroll at 32 images; prefer >=2 grid steps
    # once blocks reach >=1 MiB so v7x megacore / pipelining have overlap work)
    max_nb = min(n, 32)
    divs = [d for d in range(max_nb, 0, -1)
            if n % d == 0 and ((d * c) % 8 == 0 or d == n) and est(d) <= ceiling]
    if divs:
        multi = [d for d in divs
                 if n // d >= 2 and d * c * hw * itemsize >= (1 << 20)]
        nb = multi[0] if multi else divs[0]
        n_pad = n
    else:
        # no exact divisor works -> pad the batch to a multiple of nb
        cands = [d for d in range(max_nb, 0, -1)
                 if (d * c) % 8 == 0 and est(d) <= ceiling]
        if cands:
            nb = cands[0]
        else:
            nb = 1
            while (nb * c) % 8:
                nb += 1
        n_pad = pl.cdiv(n, nb) * nb

    if n_pad != n:
        x2 = jnp.pad(x2, ((0, (n_pad - n) * c), (0, 0)))

    vmem_limit = int(min(ceiling, max(8 * 1024 * 1024, est(nb))))

    const2d = lambda i: (0, 0)
    out2 = pl.pallas_call(
        _ca_kernel,
        out_shape=jax.ShapeDtypeStruct((n_pad * c, hw), dt),
        grid=(n_pad // nb,),
        in_specs=[
            pl.BlockSpec((nb * c, hw), lambda i: (i, 0)),     # x slab
            pl.BlockSpec((hw, h), const2d),                   # pool-H indicator
            pl.BlockSpec((hw, w), const2d),                   # pool-W indicator
            pl.BlockSpec((h, hw), const2d),                   # expand-H indicator
            pl.BlockSpec((w, hw), const2d),                   # expand-W indicator
            pl.BlockSpec((mip, c), const2d),                  # conv1 (BN folded)
            pl.BlockSpec((mip, 1), const2d),
            pl.BlockSpec((oup, mip), const2d),                # conv_h
            pl.BlockSpec((oup, 1), const2d),
            pl.BlockSpec((oup, mip), const2d),                # conv_w
            pl.BlockSpec((oup, 1), const2d),
        ],
        out_specs=pl.BlockSpec((nb * c, hw), lambda i: (i, 0)),
        compiler_params=pltpu.CompilerParams(
            dimension_semantics=("parallel",),
            vmem_limit_bytes=vmem_limit,
        ),
    )(x2, ih, iw, e_h, e_w, w1_eff, b1_eff, wh_f, bh2, ww_f, bw2)

    if n_pad != n:
        out2 = out2[: n * c]
    return out2.reshape(n, c, h, w)


def ca_block_ref(x, w1, b1, gamma, beta, run_mean, run_var, wh, bh, ww, bw, eps=1e-5):
    """Pure-JAX reference matching the PyTorch forward (eval-mode BN, f32 math)."""
    n, c, h, w = x.shape
    x_h = jnp.mean(x, axis=3)                 # (n, c, h)
    x_w = jnp.mean(x, axis=2)                 # (n, c, w)
    y = jnp.concatenate([x_h, x_w], axis=2)   # (n, c, h+w)
    y = jnp.einsum("mc,ncl->nml", w1, y, precision="highest") + b1[None, :, None]
    y = (y - run_mean[None, :, None]) / jnp.sqrt(run_var[None, :, None] + eps)
    y = y * gamma[None, :, None] + beta[None, :, None]
    y = y * (jnp.clip(y + 3.0, 0.0, 6.0) / 6.0)
    y_h, y_w = y[:, :, :h], y[:, :, h:]
    a_h = jax.nn.sigmoid(
        jnp.einsum("om,nml->nol", wh, y_h, precision="highest") + bh[None, :, None])
    a_w = jax.nn.sigmoid(
        jnp.einsum("om,nml->nol", ww, y_w, precision="highest") + bw[None, :, None])
    return x * a_w[:, :, None, :] * a_h[:, :, :, None]


if __name__ == "__main__":
    N, C, H, W = 2, 4, 16, 16
    inp = oup = C
    reduction = 32
    mip = max(8, inp // reduction)

    key = jax.random.PRNGKey(0)
    ks = jax.random.split(key, 8)
    x = jax.random.normal(ks[0], (N, C, H, W), jnp.float32)

    # Deterministic parameter init (conv 1x1 weights squeezed to 2-D).
    w1 = jax.random.normal(ks[1], (mip, inp), jnp.float32) * 0.2
    b1 = jax.random.normal(ks[2], (mip,), jnp.float32) * 0.1
    gamma = 1.0 + 0.1 * jax.random.normal(ks[3], (mip,), jnp.float32)
    beta = 0.1 * jax.random.normal(ks[4], (mip,), jnp.float32)
    run_mean = 0.05 * jax.random.normal(ks[5], (mip,), jnp.float32)
    run_var = jnp.abs(1.0 + 0.1 * jax.random.normal(ks[6], (mip,), jnp.float32))
    wh = jax.random.normal(ks[7], (oup, mip), jnp.float32) * 0.2
    bh = jnp.linspace(-0.1, 0.1, oup, dtype=jnp.float32)
    ww = jax.random.normal(jax.random.PRNGKey(42), (oup, mip), jnp.float32) * 0.2
    bw = jnp.linspace(0.1, -0.1, oup, dtype=jnp.float32)

    params = (w1, b1, gamma, beta, run_mean, run_var, wh, bh, ww, bw)

    out = ca_block(x, *params)
    out = jax.block_until_ready(out)

    ref = ca_block_ref(x, *params)
    assert out.shape == x.shape and out.dtype == x.dtype
    assert jnp.allclose(out, ref, atol=1e-4, rtol=1e-4), "mismatch vs JAX reference"

    print("KERNEL_OK")
</pallas_src>

<mosaic_0001>
module attributes {stable_mosaic.version = 11 : i64} {
  func.func @_ca_kernel(%arg0: i32, %arg1: memref<8x256xf32, #tpu.memory_space<vmem>>, %arg2: memref<256x16xbf16, #tpu.memory_space<vmem>>, %arg3: memref<256x16xbf16, #tpu.memory_space<vmem>>, %arg4: memref<16x256xbf16, #tpu.memory_space<vmem>>, %arg5: memref<16x256xbf16, #tpu.memory_space<vmem>>, %arg6: memref<8x4xf32, #tpu.memory_space<vmem>>, %arg7: memref<8x1xf32, #tpu.memory_space<vmem>>, %arg8: memref<4x8xf32, #tpu.memory_space<vmem>>, %arg9: memref<4x1xf32, #tpu.memory_space<vmem>>, %arg10: memref<4x8xf32, #tpu.memory_space<vmem>>, %arg11: memref<4x1xf32, #tpu.memory_space<vmem>>, %arg12: memref<8x256xf32, #tpu.memory_space<vmem>>) attributes {dimension_semantics = [#tpu.dimension_semantics<parallel>], iteration_bounds = array<i64: 1>, scalar_prefetch = 0 : i64, scratch_operands = 0 : i64, tpu.core_type = #tpu.core_type<tc>, window_params = [{transform_indices = @transform_0, window_bounds = array<i64: 8, 256>}, {pipeline_mode = #tpu.pipeline_mode<synchronous>, transform_indices = @transform_1, window_bounds = array<i64: 256, 16>}, {pipeline_mode = #tpu.pipeline_mode<synchronous>, transform_indices = @transform_2, window_bounds = array<i64: 256, 16>}, {pipeline_mode = #tpu.pipeline_mode<synchronous>, transform_indices = @transform_3, window_bounds = array<i64: 16, 256>}, {pipeline_mode = #tpu.pipeline_mode<synchronous>, transform_indices = @transform_4, window_bounds = array<i64: 16, 256>}, {pipeline_mode = #tpu.pipeline_mode<synchronous>, transform_indices = @transform_5, window_bounds = array<i64: 8, 4>}, {pipeline_mode = #tpu.pipeline_mode<synchronous>, transform_indices = @transform_6, window_bounds = array<i64: 8, 1>}, {pipeline_mode = #tpu.pipeline_mode<synchronous>, transform_indices = @transform_7, window_bounds = array<i64: 4, 8>}, {pipeline_mode = #tpu.pipeline_mode<synchronous>, transform_indices = @transform_8, window_bounds = array<i64: 4, 1>}, {pipeline_mode = #tpu.pipeline_mode<synchronous>, transform_indices = @transform_9, window_bounds = array<i64: 4, 8>}, {pipeline_mode = #tpu.pipeline_mode<synchronous>, transform_indices = @transform_10, window_bounds = array<i64: 4, 1>}, {transform_indices = @transform_11, window_bounds = array<i64: 8, 256>}]} {
    %c0 = arith.constant 0 : index
    %c0_0 = arith.constant 0 : index
    %0 = vector.load %arg1[%c0, %c0_0] : memref<8x256xf32, #tpu.memory_space<vmem>>, vector<8x256xf32>
    %c0_1 = arith.constant 0 : index
    %c0_2 = arith.constant 0 : index
    %1 = vector.load %arg2[%c0_1, %c0_2] : memref<256x16xbf16, #tpu.memory_space<vmem>>, vector<256x16xbf16>
    %2 = arith.truncf %0 : vector<8x256xf32> to vector<8x256xbf16>
    %cst = arith.constant dense<0.000000e+00> : vector<8x16xf32>
    %3 = tpu.matmul %2, %1, %cst {dimension_numbers = #tpu.dot_dimension_numbers<[1], [0], [0], [1], [0, 0, 1, 1], [], []>} : vector<8x256xbf16>, vector<256x16xbf16>, vector<8x16xf32> -> vector<8x16xf32>
    %4 = arith.extf %2 : vector<8x256xbf16> to vector<8x256xf32>
    %5 = arith.subf %0, %4 : vector<8x256xf32>
    %6 = arith.truncf %5 : vector<8x256xf32> to vector<8x256xbf16>
    %cst_3 = arith.constant dense<0.000000e+00> : vector<8x16xf32>
    %7 = tpu.matmul %6, %1, %cst_3 {dimension_numbers = #tpu.dot_dimension_numbers<[1], [0], [0], [1], [0, 0, 1, 1], [], []>} : vector<8x256xbf16>, vector<256x16xbf16>, vector<8x16xf32> -> vector<8x16xf32>
    %8 = arith.addf %3, %7 : vector<8x16xf32>
    %cst_4 = arith.constant 6.250000e-02 : f32
    %9 = vector.broadcast %cst_4 : f32 to vector<8x16xf32>
    %10 = arith.mulf %8, %9 : vector<8x16xf32>
    %c0_5 = arith.constant 0 : index
    %c0_6 = arith.constant 0 : index
    %11 = vector.load %arg3[%c0_5, %c0_6] : memref<256x16xbf16, #tpu.memory_space<vmem>>, vector<256x16xbf16>
    %12 = arith.truncf %0 : vector<8x256xf32> to vector<8x256xbf16>
    %cst_7 = arith.constant dense<0.000000e+00> : vector<8x16xf32>
    %13 = tpu.matmul %12, %11, %cst_7 {dimension_numbers = #tpu.dot_dimension_numbers<[1], [0], [0], [1], [0, 0, 1, 1], [], []>} : vector<8x256xbf16>, vector<256x16xbf16>, vector<8x16xf32> -> vector<8x16xf32>
    %14 = arith.extf %12 : vector<8x256xbf16> to vector<8x256xf32>
    %15 = arith.subf %0, %14 : vector<8x256xf32>
    %16 = arith.truncf %15 : vector<8x256xf32> to vector<8x256xbf16>
    %cst_8 = arith.constant dense<0.000000e+00> : vector<8x16xf32>
    %17 = tpu.matmul %16, %11, %cst_8 {dimension_numbers = #tpu.dot_dimension_numbers<[1], [0], [0], [1], [0, 0, 1, 1], [], []>} : vector<8x256xbf16>, vector<256x16xbf16>, vector<8x16xf32> -> vector<8x16xf32>
    %18 = arith.addf %13, %17 : vector<8x16xf32>
    %cst_9 = arith.constant 6.250000e-02 : f32
    %19 = vector.broadcast %cst_9 : f32 to vector<8x16xf32>
    %20 = arith.mulf %18, %19 : vector<8x16xf32>
    %c0_10 = arith.constant 0 : index
    %c0_11 = arith.constant 0 : index
    %21 = vector.load %arg6[%c0_10, %c0_11] : memref<8x4xf32, #tpu.memory_space<vmem>>, vector<8x4xf32>
    %c0_12 = arith.constant 0 : index
    %c0_13 = arith.constant 0 : index
    %22 = vector.load %arg7[%c0_12, %c0_13] : memref<8x1xf32, #tpu.memory_space<vmem>>, vector<8x1xf32>
    %c0_14 = arith.constant 0 : index
    %c0_15 = arith.constant 0 : index
    %23 = vector.load %arg8[%c0_14, %c0_15] : memref<4x8xf32, #tpu.memory_space<vmem>>, vector<4x8xf32>
    %c0_16 = arith.constant 0 : index
    %c0_17 = arith.constant 0 : index
    %24 = vector.load %arg9[%c0_16, %c0_17] : memref<4x1xf32, #tpu.memory_space<vmem>>, vector<4x1xf32>
    %c0_18 = arith.constant 0 : index
    %c0_19 = arith.constant 0 : index
    %25 = vector.load %arg10[%c0_18, %c0_19] : memref<4x8xf32, #tpu.memory_space<vmem>>, vector<4x8xf32>
    %c0_20 = arith.constant 0 : index
    %c0_21 = arith.constant 0 : index
    %26 = vector.load %arg11[%c0_20, %c0_21] : memref<4x1xf32, #tpu.memory_space<vmem>>, vector<4x1xf32>
    %27 = vector.extract_strided_slice %10 {offsets = [0, 0], sizes = [4, 16], strides = [1, 1]} : vector<8x16xf32> to vector<4x16xf32>
    %28 = vector.extract_strided_slice %20 {offsets = [0, 0], sizes = [4, 16], strides = [1, 1]} : vector<8x16xf32> to vector<4x16xf32>
    %cst_22 = arith.constant dense<0.000000e+00> : vector<8x16xf32>
    %29 = tpu.matmul %21, %27, %cst_22 {dimension_numbers = #tpu.dot_dimension_numbers<[1], [0], [0], [1], [0, 0, 1, 1], [], []>, precision = #tpu.contract_precision<fp32>} : vector<8x4xf32>, vector<4x16xf32>, vector<8x16xf32> -> vector<8x16xf32>
    %30 = vector.broadcast %22 : vector<8x1xf32> to vector<8x16xf32>
    %31 = arith.addf %29, %30 : vector<8x16xf32>
    %cst_23 = arith.constant 3.000000e+00 : f32
    %32 = vector.broadcast %cst_23 : f32 to vector<8x16xf32>
    %33 = arith.addf %31, %32 : vector<8x16xf32>
    %cst_24 = arith.constant 0.000000e+00 : f32
    %cst_25 = arith.constant 6.000000e+00 : f32
    %34 = vector.broadcast %cst_24 : f32 to vector<8x16xf32>
    %35 = arith.maximumf %34, %33 : vector<8x16xf32>
    %36 = vector.broadcast %cst_25 : f32 to vector<8x16xf32>
    %37 = arith.minimumf %36, %35 : vector<8x16xf32>
    %cst_26 = arith.constant 0.166666672 : f32
    %38 = vector.broadcast %cst_26 : f32 to vector<8x16xf32>
    %39 = arith.mulf %37, %38 : vector<8x16xf32>
    %40 = arith.mulf %31, %39 : vector<8x16xf32>
    %cst_27 = arith.constant dense<0.000000e+00> : vector<8x16xf32>
    %41 = tpu.matmul %21, %28, %cst_27 {dimension_numbers = #tpu.dot_dimension_numbers<[1], [0], [0], [1], [0, 0, 1, 1], [], []>, precision = #tpu.contract_precision<fp32>} : vector<8x4xf32>, vector<4x16xf32>, vector<8x16xf32> -> vector<8x16xf32>
    %42 = vector.broadcast %22 : vector<8x1xf32> to vector<8x16xf32>
    %43 = arith.addf %41, %42 : vector<8x16xf32>
    %cst_28 = arith.constant 3.000000e+00 : f32
    %44 = vector.broadcast %cst_28 : f32 to vector<8x16xf32>
    %45 = arith.addf %43, %44 : vector<8x16xf32>
    %cst_29 = arith.constant 0.000000e+00 : f32
    %cst_30 = arith.constant 6.000000e+00 : f32
    %46 = vector.broadcast %cst_29 : f32 to vector<8x16xf32>
    %47 = arith.maximumf %46, %45 : vector<8x16xf32>
    %48 = vector.broadcast %cst_30 : f32 to vector<8x16xf32>
    %49 = arith.minimumf %48, %47 : vector<8x16xf32>
    %cst_31 = arith.constant 0.166666672 : f32
    %50 = vector.broadcast %cst_31 : f32 to vector<8x16xf32>
    %51 = arith.mulf %49, %50 : vector<8x16xf32>
    %52 = arith.mulf %43, %51 : vector<8x16xf32>
    %cst_32 = arith.constant dense<0.000000e+00> : vector<4x16xf32>
    %53 = tpu.matmul %23, %40, %cst_32 {dimension_numbers = #tpu.dot_dimension_numbers<[1], [0], [0], [1], [0, 0, 1, 1], [], []>, precision = #tpu.contract_precision<fp32>} : vector<4x8xf32>, vector<8x16xf32>, vector<4x16xf32> -> vector<4x16xf32>
    %54 = vector.broadcast %24 : vector<4x1xf32> to vector<4x16xf32>
    %55 = arith.addf %53, %54 : vector<4x16xf32>
    %56 = arith.negf %55 : vector<4x16xf32>
    %57 = math.exp %56 : vector<4x16xf32>
    %cst_33 = arith.constant 1.000000e+00 : f32
    %58 = vector.broadcast %cst_33 : f32 to vector<4x16xf32>
    %59 = arith.addf %58, %57 : vector<4x16xf32>
    %60 = arith.divf %58, %59 : vector<4x16xf32>
    %cst_34 = arith.constant dense<0.000000e+00> : vector<4x16xf32>
    %61 = tpu.matmul %25, %52, %cst_34 {dimension_numbers = #tpu.dot_dimension_numbers<[1], [0], [0], [1], [0, 0, 1, 1], [], []>, precision = #tpu.contract_precision<fp32>} : vector<4x8xf32>, vector<8x16xf32>, vector<4x16xf32> -> vector<4x16xf32>
    %62 = vector.broadcast %26 : vector<4x1xf32> to vector<4x16xf32>
    %63 = arith.addf %61, %62 : vector<4x16xf32>
    %64 = arith.negf %63 : vector<4x16xf32>
    %65 = math.exp %64 : vector<4x16xf32>
    %cst_35 = arith.constant 1.000000e+00 : f32
    %66 = vector.broadcast %cst_35 : f32 to vector<4x16xf32>
    %67 = arith.addf %66, %65 : vector<4x16xf32>
    %68 = arith.divf %66, %67 : vector<4x16xf32>
    %69 = vector.extract_strided_slice %10 {offsets = [4, 0], sizes = [4, 16], strides = [1, 1]} : vector<8x16xf32> to vector<4x16xf32>
    %70 = vector.extract_strided_slice %20 {offsets = [4, 0], sizes = [4, 16], strides = [1, 1]} : vector<8x16xf32> to vector<4x16xf32>
    %cst_36 = arith.constant dense<0.000000e+00> : vector<8x16xf32>
    %71 = tpu.matmul %21, %69, %cst_36 {dimension_numbers = #tpu.dot_dimension_numbers<[1], [0], [0], [1], [0, 0, 1, 1], [], []>, precision = #tpu.contract_precision<fp32>} : vector<8x4xf32>, vector<4x16xf32>, vector<8x16xf32> -> vector<8x16xf32>
    %72 = vector.broadcast %22 : vector<8x1xf32> to vector<8x16xf32>
    %73 = arith.addf %71, %72 : vector<8x16xf32>
    %cst_37 = arith.constant 3.000000e+00 : f32
    %74 = vector.broadcast %cst_37 : f32 to vector<8x16xf32>
    %75 = arith.addf %73, %74 : vector<8x16xf32>
    %cst_38 = arith.constant 0.000000e+00 : f32
    %cst_39 = arith.constant 6.000000e+00 : f32
    %76 = vector.broadcast %cst_38 : f32 to vector<8x16xf32>
    %77 = arith.maximumf %76, %75 : vector<8x16xf32>
    %78 = vector.broadcast %cst_39 : f32 to vector<8x16xf32>
    %79 = arith.minimumf %78, %77 : vector<8x16xf32>
    %cst_40 = arith.constant 0.166666672 : f32
    %80 = vector.broadcast %cst_40 : f32 to vector<8x16xf32>
    %81 = arith.mulf %79, %80 : vector<8x16xf32>
    %82 = arith.mulf %73, %81 : vector<8x16xf32>
    %cst_41 = arith.constant dense<0.000000e+00> : vector<8x16xf32>
    %83 = tpu.matmul %21, %70, %cst_41 {dimension_numbers = #tpu.dot_dimension_numbers<[1], [0], [0], [1], [0, 0, 1, 1], [], []>, precision = #tpu.contract_precision<fp32>} : vector<8x4xf32>, vector<4x16xf32>, vector<8x16xf32> -> vector<8x16xf32>
    %84 = vector.broadcast %22 : vector<8x1xf32> to vector<8x16xf32>
    %85 = arith.addf %83, %84 : vector<8x16xf32>
    %cst_42 = arith.constant 3.000000e+00 : f32
    %86 = vector.broadcast %cst_42 : f32 to vector<8x16xf32>
    %87 = arith.addf %85, %86 : vector<8x16xf32>
    %cst_43 = arith.constant 0.000000e+00 : f32
    %cst_44 = arith.constant 6.000000e+00 : f32
    %88 = vector.broadcast %cst_43 : f32 to vector<8x16xf32>
    %89 = arith.maximumf %88, %87 : vector<8x16xf32>
    %90 = vector.broadcast %cst_44 : f32 to vector<8x16xf32>
    %91 = arith.minimumf %90, %89 : vector<8x16xf32>
    %cst_45 = arith.constant 0.166666672 : f32
    %92 = vector.broadcast %cst_45 : f32 to vector<8x16xf32>
    %93 = arith.mulf %91, %92 : vector<8x16xf32>
    %94 = arith.mulf %85, %93 : vector<8x16xf32>
    %cst_46 = arith.constant dense<0.000000e+00> : vector<4x16xf32>
    %95 = tpu.matmul %23, %82, %cst_46 {dimension_numbers = #tpu.dot_dimension_numbers<[1], [0], [0], [1], [0, 0, 1, 1], [], []>, precision = #tpu.contract_precision<fp32>} : vector<4x8xf32>, vector<8x16xf32>, vector<4x16xf32> -> vector<4x16xf32>
    %96 = vector.broadcast %24 : vector<4x1xf32> to vector<4x16xf32>
    %97 = arith.addf %95, %96 : vector<4x16xf32>
    %98 = arith.negf %97 : vector<4x16xf32>
    %99 = math.exp %98 : vector<4x16xf32>
    %cst_47 = arith.constant 1.000000e+00 : f32
    %100 = vector.broadcast %cst_47 : f32 to vector<4x16xf32>
    %101 = arith.addf %100, %99 : vector<4x16xf32>
    %102 = arith.divf %100, %101 : vector<4x16xf32>
    %cst_48 = arith.constant dense<0.000000e+00> : vector<4x16xf32>
    %103 = tpu.matmul %25, %94, %cst_48 {dimension_numbers = #tpu.dot_dimension_numbers<[1], [0], [0], [1], [0, 0, 1, 1], [], []>, precision = #tpu.contract_precision<fp32>} : vector<4x8xf32>, vector<8x16xf32>, vector<4x16xf32> -> vector<4x16xf32>
    %104 = vector.broadcast %26 : vector<4x1xf32> to vector<4x16xf32>
    %105 = arith.addf %103, %104 : vector<4x16xf32>
    %106 = arith.negf %105 : vector<4x16xf32>
    %107 = math.exp %106 : vector<4x16xf32>
    %cst_49 = arith.constant 1.000000e+00 : f32
    %108 = vector.broadcast %cst_49 : f32 to vector<4x16xf32>
    %109 = arith.addf %108, %107 : vector<4x16xf32>
    %110 = arith.divf %108, %109 : vector<4x16xf32>
    %111 = tpu.concatenate %60, %102 in 0 : vector<4x16xf32>, vector<4x16xf32> -> vector<8x16xf32>
    %112 = tpu.concatenate %68, %110 in 0 : vector<4x16xf32>, vector<4x16xf32> -> vector<8x16xf32>
    %c0_50 = arith.constant 0 : index
    %c0_51 = arith.constant 0 : index
    %113 = vector.load %arg4[%c0_50, %c0_51] : memref<16x256xbf16, #tpu.memory_space<vmem>>, vector<16x256xbf16>
    %114 = arith.truncf %111 : vector<8x16xf32> to vector<8x16xbf16>
    %cst_52 = arith.constant dense<0.000000e+00> : vector<8x256xf32>
    %115 = tpu.matmul %114, %113, %cst_52 {dimension_numbers = #tpu.dot_dimension_numbers<[1], [0], [0], [1], [0, 0, 1, 1], [], []>} : vector<8x16xbf16>, vector<16x256xbf16>, vector<8x256xf32> -> vector<8x256xf32>
    %116 = arith.extf %114 : vector<8x16xbf16> to vector<8x16xf32>
    %117 = arith.subf %111, %116 : vector<8x16xf32>
    %118 = arith.truncf %117 : vector<8x16xf32> to vector<8x16xbf16>
    %cst_53 = arith.constant dense<0.000000e+00> : vector<8x256xf32>
    %119 = tpu.matmul %118, %113, %cst_53 {dimension_numbers = #tpu.dot_dimension_numbers<[1], [0], [0], [1], [0, 0, 1, 1], [], []>} : vector<8x16xbf16>, vector<16x256xbf16>, vector<8x256xf32> -> vector<8x256xf32>
    %120 = arith.addf %115, %119 : vector<8x256xf32>
    %c0_54 = arith.constant 0 : index
    %c0_55 = arith.constant 0 : index
    %121 = vector.load %arg5[%c0_54, %c0_55] : memref<16x256xbf16, #tpu.memory_space<vmem>>, vector<16x256xbf16>
    %122 = arith.truncf %112 : vector<8x16xf32> to vector<8x16xbf16>
    %cst_56 = arith.constant dense<0.000000e+00> : vector<8x256xf32>
    %123 = tpu.matmul %122, %121, %cst_56 {dimension_numbers = #tpu.dot_dimension_numbers<[1], [0], [0], [1], [0, 0, 1, 1], [], []>} : vector<8x16xbf16>, vector<16x256xbf16>, vector<8x256xf32> -> vector<8x256xf32>
    %124 = arith.extf %122 : vector<8x16xbf16> to vector<8x16xf32>
    %125 = arith.subf %112, %124 : vector<8x16xf32>
    %126 = arith.truncf %125 : vector<8x16xf32> to vector<8x16xbf16>
    %cst_57 = arith.constant dense<0.000000e+00> : vector<8x256xf32>
    %127 = tpu.matmul %126, %121, %cst_57 {dimension_numbers = #tpu.dot_dimension_numbers<[1], [0], [0], [1], [0, 0, 1, 1], [], []>} : vector<8x16xbf16>, vector<16x256xbf16>, vector<8x256xf32> -> vector<8x256xf32>
    %128 = arith.addf %123, %127 : vector<8x256xf32>
    %129 = arith.mulf %0, %120 : vector<8x256xf32>
    %130 = arith.mulf %129, %128 : vector<8x256xf32>
    %c0_58 = arith.constant 0 : index
    %c0_59 = arith.constant 0 : index
    %131 = vector.load %arg12[%c0_58, %c0_59] : memref<8x256xf32, #tpu.memory_space<vmem>>, vector<8x256xf32>
    tpu.vector_store %arg12[%c0_58, %c0_59], %130 {strides = array<i32>} : memref<8x256xf32, #tpu.memory_space<vmem>>, vector<8x256xf32>,
    return
  }
  func.func @transform_0(%arg0: i32) -> (i32, i32) {
    %c0_i32 = arith.constant 0 : i32
    %c0_i32_0 = arith.constant 0 : i32
    return %arg0, %c0_i32 : i32, i32
  }
  func.func @transform_1(%arg0: i32) -> (i32, i32) {
    %c0_i32 = arith.constant 0 : i32
    %c0_i32_0 = arith.constant 0 : i32
    %c0_i32_1 = arith.constant 0 : i32
    return %c0_i32, %c0_i32_0 : i32, i32
  }
  func.func @transform_2(%arg0: i32) -> (i32, i32) {
    %c0_i32 = arith.constant 0 : i32
    %c0_i32_0 = arith.constant 0 : i32
    %c0_i32_1 = arith.constant 0 : i32
    return %c0_i32, %c0_i32_0 : i32, i32
  }
  func.func @transform_3(%arg0: i32) -> (i32, i32) {
    %c0_i32 = arith.constant 0 : i32
    %c0_i32_0 = arith.constant 0 : i32
    %c0_i32_1 = arith.constant 0 : i32
    return %c0_i32, %c0_i32_0 : i32, i32
  }
  func.func @transform_4(%arg0: i32) -> (i32, i32) {
    %c0_i32 = arith.constant 0 : i32
    %c0_i32_0 = arith.constant 0 : i32
    %c0_i32_1 = arith.constant 0 : i32
    return %c0_i32, %c0_i32_0 : i32, i32
  }
  func.func @transform_5(%arg0: i32) -> (i32, i32) {
    %c0_i32 = arith.constant 0 : i32
    %c0_i32_0 = arith.constant 0 : i32
    %c0_i32_1 = arith.constant 0 : i32
    return %c0_i32, %c0_i32_0 : i32, i32
  }
  func.func @transform_6(%arg0: i32) -> (i32, i32) {
    %c0_i32 = arith.constant 0 : i32
    %c0_i32_0 = arith.constant 0 : i32
    %c0_i32_1 = arith.constant 0 : i32
    return %c0_i32, %c0_i32_0 : i32, i32
  }
  func.func @transform_7(%arg0: i32) -> (i32, i32) {
    %c0_i32 = arith.constant 0 : i32
    %c0_i32_0 = arith.constant 0 : i32
    %c0_i32_1 = arith.constant 0 : i32
    return %c0_i32, %c0_i32_0 : i32, i32
  }
  func.func @transform_8(%arg0: i32) -> (i32, i32) {
    %c0_i32 = arith.constant 0 : i32
    %c0_i32_0 = arith.constant 0 : i32
    %c0_i32_1 = arith.constant 0 : i32
    return %c0_i32, %c0_i32_0 : i32, i32
  }
  func.func @transform_9(%arg0: i32) -> (i32, i32) {
    %c0_i32 = arith.constant 0 : i32
    %c0_i32_0 = arith.constant 0 : i32
    %c0_i32_1 = arith.constant 0 : i32
    return %c0_i32, %c0_i32_0 : i32, i32
  }
  func.func @transform_10(%arg0: i32) -> (i32, i32) {
    %c0_i32 = arith.constant 0 : i32
    %c0_i32_0 = arith.constant 0 : i32
    %c0_i32_1 = arith.constant 0 : i32
    return %c0_i32, %c0_i32_0 : i32, i32
  }
  func.func @transform_11(%arg0: i32) -> (i32, i32) {
    %c0_i32 = arith.constant 0 : i32
    %c0_i32_0 = arith.constant 0 : i32
    return %arg0, %c0_i32 : i32, i32
  }
}

</mosaic_0001>

<bundles_post_ra>
// kernel: ca_block.1
= control target key start
LH: loop header
LB: loop body
LE: loop exit
PB: predicated region body
PF: predicated region fallthrough
CT: control target
= control target key end

     0   :  { %v4976_v42 = vmov 0.0   ;;  %vm4977_vm0 = vmmov 0   ;;  %v4978_v43 = vmov 0   ;;  %vm478_vm1 = vcmask 31744   ;;  %s5460_s1 = inlined_call_operand.vmem [shape: bf16[256,16], index: 1, kind: input, shape index: {}]   ;;  %s5461_s0 = inlined_call_operand.vmem [shape: f32[8,256], index: 0, kind: input, shape index: {}]   ;;  %s5462_s2 = inlined_call_operand.vmem [shape: bf16[256,16], index: 2, kind: input, shape index: {}]   ;;  %s5463_s6 = inlined_call_operand.vmem [shape: f32[8,1], index: 6, kind: input, shape index: {}]   ;;  %s5464_s8 = inlined_call_operand.vmem [shape: f32[4,1], index: 8, kind: input, shape index: {}]   ;;  %s5465_s5 = inlined_call_operand.vmem [shape: f32[8,4], index: 5, kind: input, shape index: {}]   ;;  %s5466_s7 = inlined_call_operand.vmem [shape: f32[4,8], index: 7, kind: input, shape index: {}]   ;;  %s5467_s10 = inlined_call_operand.vmem [shape: f32[4,1], index: 10, kind: input, shape index: {}]   ;;  %s5468_s9 = inlined_call_operand.vmem [shape: f32[4,8], index: 9, kind: input, shape index: {}]   ;;  %s5469_s3 = inlined_call_operand.vmem [shape: bf16[16,256], index: 3, kind: input, shape index: {}]   ;;  %s5470_s4 = inlined_call_operand.vmem [shape: bf16[16,256], index: 4, kind: input, shape index: {}]   ;;  %s5471_s11 = inlined_call_operand.vmem [shape: f32[8,256], index: 11, kind: output, shape index: {}]  }
   0x1   :  { %v4920_v0 = vld [vmem:[%s5460_s1 + $0x40] sm:$0xff]   ;;  %v4922_v2 = vld [vmem:[%s5460_s1 + $0x48] sm:$0xff]   ;;  %v4924_v4 = vld [vmem:[%s5460_s1 + $0x50] sm:$0xff]   ;;  %4918 = vset.pattern.permute.xlu0 %v4978_v43  ;;  %4919 = vset.pattern.permute.xlu1 %v4978_v43  ;;  %vm482_vm2 = vcmask 1043456   ;;  %vm1396_vm3 = vcmask 64512   ;;  %vm4148_vm4 = vcmask 130048  }
   0x2   :  { %v4921_v1 = vld [vmem:[%s5460_s1] sm:$0xff]   ;;  %4395 = vmatprep.subr.bf16.mxu0 %v4920_v0  ;;  %4417 = vmatprep.subr.bf16.mxu1 %v4920_v0  ;;  %v4923_v3 = vld [vmem:[%s5460_s1 + $0x8] sm:$0xff]   ;;  %v4925_v5 = vld [vmem:[%s5460_s1 + $0x10] sm:$0xff]  }
   0x3   :  { %4396 = vmatpush3.bf16.msra.mxu0 %v4921_v1  ;;  %4418 = vmatpush3.bf16.msra.mxu1 %v4921_v1  ;;  %v4926_v6 = vld [vmem:[%s5460_s1 + $0x58] sm:$0xff]   ;;  %v4928_v8 = vld [vmem:[%s5460_s1 + $0x60] sm:$0xff]   ;;  %v4930_v10 = vld [vmem:[%s5460_s1 + $0x68] sm:$0xff]  }
   0x4   :  { %4397 = vmatprep.subr.bf16.mxu0 %v4922_v2  ;;  %4419 = vmatprep.subr.bf16.mxu1 %v4922_v2  ;;  %v4927_v7 = vld [vmem:[%s5460_s1 + $0x18] sm:$0xff]   ;;  %v4929_v9 = vld [vmem:[%s5460_s1 + $0x20] sm:$0xff]   ;;  %v40_v12 = vld [vmem:[%s5461_s0 + $0x8] sm:$0xff] }
   0x5   :  { %v39_v11 = vld [vmem:[%s5461_s0] sm:$0xff]  ;;  %v74_v13 = vpack.c.bf16 %v40_v12, %v40_v12  ;;  %v4931_v15 = vld [vmem:[%s5460_s1 + $0x28] sm:$0xff]   ;;  %v4932_v17 = vld [vmem:[%s5460_s1 + $0x70] sm:$0xff]  }
   0x6   :  { %v5078_v14 = vpack.c.bf16 %v39_v11, %v39_v11  ;;  %v4933_v20 = vld [vmem:[%s5460_s1 + $0x30] sm:$0xff]   ;;  %v4934_v22 = vld [vmem:[%s5460_s1 + $0x78] sm:$0xff]   ;;  %v4936_v25 = vld [vmem:[%s5462_s2 + $0x40] sm:$0xff]  }
   0x7   :  { %4398 = vmatpush3.bf16.msra.mxu0 %v4923_v3  ;;  %4420 = vmatpush3.bf16.msra.mxu1 %v4923_v3  ;;  %v76_v16 = vunpack.c.l.bf16 %v74_v13  ;;  %v4935_v24 = vld [vmem:[%s5460_s1 + $0x38] sm:$0xff]   ;;  %v4937_v27 = vld [vmem:[%s5462_s2] sm:$0xff]   ;;  %v4938_v28 = vld [vmem:[%s5462_s2 + $0x48] sm:$0xff]  }
   0x8   :  { %4399 = vmatprep.subr.bf16.mxu0 %v4924_v4  ;;  %4421 = vmatprep.subr.bf16.mxu1 %v4924_v4  ;;  %v75_v19 = vunpack.c.l.bf16 %v5078_v14  ;;  %v4939_v29 = vld [vmem:[%s5462_s2 + $0x8] sm:$0xff]   ;;  %v4940_v30 = vld [vmem:[%s5462_s2 + $0x50] sm:$0xff]   ;;  %v4942_v32 = vld [vmem:[%s5462_s2 + $0x58] sm:$0xff]  }
   0x9   :  { %v78_v18 = vsub.f32 %v40_v12, %v76_v16  ;;  %249 = vmatprep.mubr.bf16.mxu1 %v74_v13  ;;  %v4941_v31 = vld [vmem:[%s5462_s2 + $0x10] sm:$0xff]   ;;  %v4943_v33 = vld [vmem:[%s5462_s2 + $0x18] sm:$0xff]   ;;  %v4944_v34 = vld [vmem:[%s5462_s2 + $0x60] sm:$0xff]  }
   0xa   :  { %v77_v23 = vsub.f32 %v39_v11, %v75_v19  ;;  %v4945_v35 = vld [vmem:[%s5462_s2 + $0x20] sm:$0xff]   ;;  %v4946_v36 = vld [vmem:[%s5462_s2 + $0x68] sm:$0xff]   ;;  %v4948_v38 = vld [vmem:[%s5462_s2 + $0x70] sm:$0xff]  }
   0xb   :  { %4400 = vmatpush3.bf16.msra.mxu0 %v4925_v5  ;;  %4422 = vmatpush3.bf16.msra.mxu1 %v4925_v5  ;;  %v80_v21 = vpack.c.bf16 %v78_v18, %v78_v18  ;;  %v4947_v37 = vld [vmem:[%s5462_s2 + $0x28] sm:$0xff]   ;;  %v4949_v39 = vld [vmem:[%s5462_s2 + $0x30] sm:$0xff]   ;;  %v4950_v40 = vld [vmem:[%s5462_s2 + $0x78] sm:$0xff]  }
   0xc   :  { %4401 = vmatprep.subr.bf16.mxu0 %v4926_v6  ;;  %4423 = vmatprep.subr.bf16.mxu1 %v4926_v6  ;;  %v79_v26 = vpack.c.bf16 %v77_v23, %v77_v23  ;;  %v4951_v41 = vld [vmem:[%s5462_s2 + $0x38] sm:$0xff]   ;;  %v468_v44 = vld [vmem:[%s5463_s6] sm:$0xff] }
   0xd   :  { %209 = vmatprep.mubr.bf16.mxu0 %v80_v21  ;;  %475 = vperm.xlu0 %4918, %v468_v44   ;;  %v470_v45 = vld [vmem:[%s5464_s8] sm:$0xf] }
   0xe   :  { %v467_v46 = vld [vmem:[%s5465_s5] sm:$0xff] }
   0xf   :  { %4402 = vmatpush3.bf16.msra.mxu0 %v4927_v7  ;;  %4424 = vmatpush3.bf16.msra.mxu1 %v4927_v7  ;;  %v480_v47 = vsel %vm478_vm1, %v467_v46, 0 }
  0x10   :  { %4403 = vmatprep.subr.bf16.mxu0 %v4928_v8  ;;  %4425 = vmatprep.subr.bf16.mxu1 %v4928_v8  ;;  %v5163_v48 = vand.u32 4294901760, %v480_v47 }
  0x11   :  { %1393 = vperm.xlu0 %4918, %v470_v45  }
  0x12   :  { %v5166_v49 = vsub.f32 %v480_v47, %v5163_v48 }
  0x13   :  { %4404 = vmatpush3.bf16.msra.mxu0 %v4929_v9  ;;  %4426 = vmatpush3.bf16.msra.mxu1 %v4929_v9 }
  0x14   :  { %4405 = vmatprep.subr.bf16.mxu0 %v4930_v10  ;;  %4427 = vmatprep.subr.bf16.mxu1 %v4930_v10  ;;  %v5169_v52 = vand.u32 4294901760, %v5166_v49 }
  0x16   :  { %v555_v62 = vsub.f32 %v5166_v49, %v5169_v52 }
  0x17   :  { %4406 = vmatpush3.bf16.msra.mxu0 %v4931_v15  ;;  %4428 = vmatpush3.bf16.msra.mxu1 %v4931_v15 }
  0x18   :  { %4407 = vmatprep.subr.bf16.mxu0 %v4932_v17  ;;  %4429 = vmatprep.subr.bf16.mxu1 %v4932_v17  ;;  %v5177_v1 = vand.u32 4294901760, %v555_v62 }
  0x1b   :  { %4408 = vmatpush3.bf16.msra.mxu0 %v4933_v20  ;;  %4430 = vmatpush3.bf16.msra.mxu1 %v4933_v20 }
  0x1c   :  { %4409 = vmatprep.subr.bf16.mxu0 %v4934_v22  ;;  %4431 = vmatprep.subr.bf16.mxu1 %v4934_v22 }
  0x1f   :  { %4410 = vmatpush3.bf16.msra.mxu0 %v4935_v24  ;;  %4432 = vmatpush3.bf16.msra.mxu1 %v4935_v24 }
  0x20   :  { %4439 = vmatprep.subr.bf16.mxu0 %v4936_v25  ;;  %4461 = vmatprep.subr.bf16.mxu1 %v4936_v25  ;;  %v469_v25 = vld [vmem:[%s5466_s7] sm:$0xf] }
  0x22   :  { %210 = vmatmul.mubr.bf16.vlgmr.msra.gmra.mrb[0].mxu0 %v79_v26  ;;  %250 = vmatmul.mubr.bf16.vlgmr.msra.gmra.mrb[0].mxu1 %v5078_v14 }
  0x23   :  { %4440 = vmatpush3.bf16.msra.mxu0 %v4937_v27  ;;  %4462 = vmatpush3.bf16.msra.mxu1 %v4937_v27 }
  0x24   :  { %4441 = vmatprep.subr.bf16.mxu0 %v4938_v28  ;;  %4463 = vmatprep.subr.bf16.mxu1 %v4938_v28 }
  0x25   :  { %418 = vmatprep.mubr.bf16.mxu0 %v80_v21  ;;  %458 = vmatprep.mubr.bf16.mxu1 %v74_v13 }
  0x27   :  { %4442 = vmatpush3.bf16.msra.mxu0 %v4939_v29  ;;  %4464 = vmatpush3.bf16.msra.mxu1 %v4939_v29 }
  0x28   :  { %4443 = vmatprep.subr.bf16.mxu0 %v4940_v30  ;;  %4465 = vmatprep.subr.bf16.mxu1 %v4940_v30 }
  0x2b   :  { %4444 = vmatpush3.bf16.msra.mxu0 %v4941_v31  ;;  %4466 = vmatpush3.bf16.msra.mxu1 %v4941_v31 }
  0x2c   :  { %4445 = vmatprep.subr.bf16.mxu0 %v4942_v32  ;;  %4467 = vmatprep.subr.bf16.mxu1 %v4942_v32 }
  0x2f   :  { %4446 = vmatpush3.bf16.msra.mxu0 %v4943_v33  ;;  %4468 = vmatpush3.bf16.msra.mxu1 %v4943_v33 }
  0x30   :  { %4447 = vmatprep.subr.bf16.mxu0 %v4944_v34  ;;  %4469 = vmatprep.subr.bf16.mxu1 %v4944_v34 }
  0x33   :  { %4448 = vmatpush3.bf16.msra.mxu0 %v4945_v35  ;;  %4470 = vmatpush3.bf16.msra.mxu1 %v4945_v35 }
  0x34   :  { %4449 = vmatprep.subr.bf16.mxu0 %v4946_v36  ;;  %4471 = vmatprep.subr.bf16.mxu1 %v4946_v36  ;;  %v472_v36 = vld [vmem:[%s5467_s10] sm:$0xf] }
  0x35   :  { %1854 = vperm.xlu1 %4919, %v472_v36  }
  0x37   :  { %4450 = vmatpush3.bf16.msra.mxu0 %v4947_v37  ;;  %4472 = vmatpush3.bf16.msra.mxu1 %v4947_v37 }
  0x38   :  { %4451 = vmatprep.subr.bf16.mxu0 %v4948_v38  ;;  %4473 = vmatprep.subr.bf16.mxu1 %v4948_v38 }
  0x3b   :  { %4452 = vmatpush3.bf16.msra.mxu0 %v4949_v39  ;;  %4474 = vmatpush3.bf16.msra.mxu1 %v4949_v39 }
  0x3c   :  { %4453 = vmatprep.subr.bf16.mxu0 %v4950_v40  ;;  %4475 = vmatprep.subr.bf16.mxu1 %v4950_v40 }
  0x3f   :  { %4454 = vmatpush3.bf16.msra.mxu0 %v4951_v41  ;;  %4476 = vmatpush3.bf16.msra.mxu1 %v4951_v41 }
  0x40   :  { %4579 = vmatprep.subr.mxu0 %v4976_v42  ;;  %4609 = vmatprep.subr.mxu1 %v4976_v42 }
  0x42   :  { %419 = vmatmul.mubr.bf16.vlgmr.msra.gmra.mrb[4].mxu0 %v79_v26  ;;  %459 = vmatmul.mubr.bf16.vlgmr.msra.gmra.mrb[4].mxu1 %v5078_v14  ;;  %v1398_v26 = vsel %vm1396_vm3, %v469_v25, 0 }
  0x43   :  { %4581 = vmatprep.mubr.msk.f32.mxu0 %vm4977_vm0, %v4976_v42  ;;  %4611 = vmatprep.mubr.msk.f32.mxu1 %vm4977_vm0, %v4976_v42  ;;  %v5235_v27 = vand.u32 4294901760, %v1398_v26 }
  0x45   :  { %v5240_v30 = vsub.f32 %v1398_v26, %v5235_v27 }
  0x47   :  { %v5244_v34 = vand.u32 4294901760, %v5240_v30 }
  0x49   :  { %v1469_v38 = vsub.f32 %v5240_v30, %v5244_v34 }
  0x4b   :  { %v5251_v41 = vand.u32 4294901760, %v1469_v38 }
  0x8c   :  { %v5237_v28 = vpop.permute.xlu0 %475 }
  0xf5   :  { %v4411_v50 = vpop.f32.mrb[0].mxu0  ;;  %v4433_v51 = vpop.f32.mrb[0].mxu1 }
  0xf6   :  { %v4412_v53 = vpop.f32.mrb[1].mxu0  ;;  %v4434_v54 = vpop.f32.mrb[1].mxu1 }
  0xf7   :  { %v4413_v55 = vadd.f32 %v4412_v53, %v4411_v50  ;;  %v4435_v56 = vadd.f32 %v4434_v54, %v4433_v51  ;;  %v4414_v57 = vpop.f32.mrb[2].mxu0  ;;  %v4436_v58 = vpop.f32.mrb[2].mxu1  ;;  %v471_v51 = vld [vmem:[%s5468_s9] sm:$0xf] }
  0xf8   :  { %v4415_v59 = vpop.f32.mrb[3].mxu0  ;;  %v4437_v60 = vpop.f32.mrb[3].mxu1  ;;  %v1858_v53 = vsel %vm1396_vm3, %v471_v51, 0 }
  0xf9   :  { %v252_v61 = vadd.f32 %v4435_v56, %v4413_v55  ;;  %v5266_v54 = vand.u32 4294901760, %v1858_v53 }
  0xfb   :  { %v5173_v63 = vmul.f32 0.0625, %v252_v61  ;;  %v5270_v56 = vsub.f32 %v1858_v53, %v5266_v54 }
  0xfd   :  { %v484_v0 = vsel %vm482_vm2, %v5173_v63, 0  ;;  %v2312_v60 = vrot.slane %v5173_v63, 4  ;;  %v5278_v61 = vand.u32 4294901760, %v5270_v56 }
  0xfe   :  { %v487_v2 = vand.u32 4294901760, %v484_v0 }
 0x100   :  { %v564_v3 = vsub.f32 %v484_v0, %v487_v2  ;;  %4580 = vmatpush3.msra.mxu0 %v487_v2 }
 0x101   :  { %4582 = vmatmul.mubr.f32.vlgmr.msra.gmra.mrb[8].mxu0 %v5177_v1  ;;  %4584 = vmatprep.subr.mxu0 %v4976_v42 }
 0x102   :  { %v565_v4 = vand.u32 4294901760, %v564_v3  ;;  %4586 = vmatprep.mubr.msk.f32.mxu0 %vm4977_vm0, %v4976_v42 }
 0x104   :  { %v566_v5 = vsub.f32 %v564_v3, %v565_v4 }
 0x106   :  { %v567_v6 = vand.u32 4294901760, %v566_v5 }
 0x108   :  { %4585 = vmatpush3.msra.mxu0 %v567_v6 }
 0x109   :  { %4587 = vmatmul.mubr.f32.vlgmr.msra.gmra.mrb[8].mxu0 %v5163_v48  ;;  %4589 = vmatprep.subr.mxu0 %v4976_v42 }
 0x10a   :  { %4590 = vmatpush3.msra.mxu0 %v564_v3  ;;  %4591 = vmatprep.mubr.msk.f32.mxu0 %vm4977_vm0, %v4976_v42  ;;  %v1929_v3 = vsub.f32 %v5270_v56, %v5278_v61 }
 0x10b   :  { %4594 = vmatprep.subr.mxu0 %v4976_v42 }
 0x10c   :  { %v5289_v6 = vand.u32 4294901760, %v1929_v3 }
 0x111   :  { %4592 = vmatmul.mubr.f32.vlgmr.msra.gmra.mrb[8].mxu0 %v5166_v49 }
 0x112   :  { %4595 = vmatpush3.msra.mxu0 %v487_v2  ;;  %4596 = vmatprep.mubr.msk.f32.mxu0 %vm4977_vm0, %v4976_v42 }
 0x113   :  { %4599 = vmatprep.subr.mxu0 %v4976_v42 }
 0x115   :  { %v4455_v7 = vpop.f32.mrb[4].mxu0  ;;  %v4477_v8 = vpop.f32.mrb[4].mxu1 }
 0x116   :  { %v4456_v9 = vpop.f32.mrb[5].mxu0  ;;  %v4478_v10 = vpop.f32.mrb[5].mxu1 }
 0x117   :  { %v4457_v11 = vadd.f32 %v4456_v9, %v4455_v7  ;;  %v4479_v12 = vadd.f32 %v4478_v10, %v4477_v8  ;;  %v4458_v13 = vpop.f32.mrb[6].mxu0  ;;  %v4480_v14 = vpop.f32.mrb[6].mxu1 }
 0x118   :  { %v4459_v15 = vpop.f32.mrb[7].mxu0  ;;  %v4481_v16 = vpop.f32.mrb[7].mxu1 }
 0x119   :  { %v461_v17 = vadd.f32 %v4479_v12, %v4457_v11  ;;  %4597 = vmatmul.mubr.f32.vlgmr.msra.gmra.mrb[8].mxu0 %v5169_v52 }
 0x11a   :  { %4600 = vmatpush3.msra.mxu0 %v565_v4  ;;  %4601 = vmatprep.mubr.msk.f32.mxu0 %vm4977_vm0, %v4976_v42 }
 0x11b   :  { %v5195_v18 = vmul.f32 0.0625, %v461_v17  ;;  %4604 = vmatprep.subr.mxu0 %v4976_v42 }
 0x11d   :  { %v938_v19 = vsel %vm482_vm2, %v5195_v18, 0  ;;  %v2766_v16 = vrot.slane %v5195_v18, 4 }
 0x11e   :  { %v941_v20 = vand.u32 4294901760, %v938_v19 }
 0x11f   :  { %v2767_v17 = vsel %vm482_vm2, %v2766_v16, 0 }
 0x120   :  { %v1018_v21 = vsub.f32 %v938_v19, %v941_v20  ;;  %4610 = vmatpush3.msra.mxu1 %v941_v20  ;;  %v2770_v19 = vand.u32 4294901760, %v2767_v17 }
 0x121   :  { %4602 = vmatmul.mubr.f32.vlgmr.msra.gmra.mrb[8].mxu0 %v5163_v48  ;;  %4612 = vmatmul.mubr.f32.vlgmr.msra.gmra.mrb[8].mxu1 %v5177_v1 }
 0x122   :  { %4605 = vmatpush3.msra.mxu0 %v487_v2  ;;  %4614 = vmatprep.subr.mxu1 %v4976_v42  ;;  %v1019_v22 = vand.u32 4294901760, %v1018_v21  ;;  %v2313_v2 = vsel %vm482_vm2, %v2312_v60, 0  ;;  %v2847_v18 = vsub.f32 %v2767_v17, %v2770_v19 }
 0x123   :  { %4606 = vmatprep.mubr.msk.f32.mxu0 %vm4977_vm0, %v4976_v42  ;;  %4616 = vmatprep.mubr.msk.f32.mxu1 %vm4977_vm0, %v4976_v42  ;;  %v5287_v5 = vand.u32 4294901760, %v2313_v2 }
 0x124   :  { %v1020_v23 = vsub.f32 %v1018_v21, %v1019_v22  ;;  %4639 = vmatprep.subr.mxu0 %v4976_v42 }
 0x125   :  { %v2393_v9 = vsub.f32 %v2313_v2, %v5287_v5 }
 0x126   :  { %v1021_v24 = vand.u32 4294901760, %v1020_v23 }
 0x127   :  { %v2394_v12 = vand.u32 4294901760, %v2393_v9 }
 0x128   :  { %4615 = vmatpush3.msra.mxu1 %v1021_v24 }
 0x129   :  { %4607 = vmatmul.mubr.f32.vlgmr.msra.gmra.mrb[8].mxu0 %v5163_v48  ;;  %4617 = vmatmul.mubr.f32.vlgmr.msra.gmra.mrb[8].mxu1 %v5163_v48  ;;  %v2395_v14 = vsub.f32 %v2393_v9, %v2394_v12 }
 0x12a   :  { %4619 = vmatprep.subr.mxu1 %v4976_v42  ;;  %4621 = vmatprep.mubr.msk.f32.mxu1 %vm4977_vm0, %v4976_v42 }
 0x12b   :  { %4620 = vmatpush3.msra.mxu1 %v1018_v21  ;;  %4641 = vmatprep.mubr.msk.f32.mxu0 %vm4977_vm0, %v4976_v42  ;;  %v2396_v15 = vand.u32 4294901760, %v2395_v14 }
 0x12c   :  { %4624 = vmatprep.subr.mxu1 %v4976_v42 }
 0x131   :  { %4622 = vmatmul.mubr.f32.vlgmr.msra.gmra.mrb[8].mxu1 %v5166_v49 }
 0x132   :  { %4625 = vmatpush3.msra.mxu1 %v941_v20  ;;  %4626 = vmatprep.mubr.msk.f32.mxu1 %vm4977_vm0, %v4976_v42 }
 0x133   :  { %4629 = vmatprep.subr.mxu1 %v4976_v42 }
 0x139   :  { %4627 = vmatmul.mubr.f32.vlgmr.msra.gmra.mrb[8].mxu1 %v5169_v52 }
 0x13a   :  { %4630 = vmatpush3.msra.mxu1 %v1019_v22  ;;  %4631 = vmatprep.mubr.msk.f32.mxu1 %vm4977_vm0, %v4976_v42 }
 0x13b   :  { %4634 = vmatprep.subr.mxu1 %v4976_v42 }
 0x141   :  { %4632 = vmatmul.mubr.f32.vlgmr.msra.gmra.mrb[8].mxu1 %v5163_v48 }
 0x142   :  { %4635 = vmatpush3.msra.mxu1 %v941_v20  ;;  %4636 = vmatprep.mubr.msk.f32.mxu1 %vm4977_vm0, %v4976_v42  ;;  %v2848_v20 = vand.u32 4294901760, %v2847_v18 }
 0x143   :  { %4669 = vmatprep.subr.mxu1 %v4976_v42 }
 0x144   :  { %v2849_v21 = vsub.f32 %v2847_v18, %v2848_v20 }
 0x146   :  { %v2850_v22 = vand.u32 4294901760, %v2849_v21 }
 0x149   :  { %4637 = vmatmul.mubr.f32.vlgmr.msra.gmra.mrb[8].mxu1 %v5163_v48 }
 0x14a   :  { %4671 = vmatprep.mubr.msk.f32.mxu1 %vm4977_vm0, %v4976_v42 }
 0x1fc   :  { %v928_v29 = vpop.f32.mrb[8].mxu0 }
 0x1fd   :  { %v4819_v31 = vadd.f32 %v928_v29, %v5237_v28  ;;  %v4608_v32 = vpop.f32.mrb[9].mxu0 }
 0x1ff   :  { %v932_v33 = vadd.f32 3.0, %v4819_v31 }
 0x201   :  { %v933_v35 = vmax.f32 %v932_v33, 0.0 }
 0x203   :  { %v934_v37 = vmin.f32 %v933_v35, 6.0 }
 0x205   :  { %v935_v39 = vmul.f32 0.16666667, %v934_v37 }
 0x207   :  { %v936_v40 = vmul.f32 %v4819_v31, %v935_v39 }
 0x209   :  { %v1401_v44 = vand.u32 4294901760, %v936_v40 }
 0x20b   :  { %v1478_v45 = vsub.f32 %v936_v40, %v1401_v44  ;;  %4640 = vmatpush3.msra.mxu0 %v1401_v44 }
 0x20c   :  { %4642 = vmatmul.mubr.f32.vlgmr.msra.gmra.mrb[10].mxu0 %v5251_v41  ;;  %4644 = vmatprep.subr.mxu0 %v4976_v42 }
 0x20d   :  { %v1479_v46 = vand.u32 4294901760, %v1478_v45  ;;  %4646 = vmatprep.mubr.msk.f32.mxu0 %vm4977_vm0, %v4976_v42 }
 0x20f   :  { %v1480_v47 = vsub.f32 %v1478_v45, %v1479_v46 }
 0x211   :  { %v1481_v50 = vand.u32 4294901760, %v1480_v47 }
 0x213   :  { %4645 = vmatpush3.msra.mxu0 %v1481_v50 }
 0x214   :  { %4647 = vmatmul.mubr.f32.vlgmr.msra.gmra.mrb[10].mxu0 %v5235_v27  ;;  %4649 = vmatprep.subr.mxu0 %v4976_v42 }
 0x215   :  { %4650 = vmatpush3.msra.mxu0 %v1478_v45  ;;  %4651 = vmatprep.mubr.msk.f32.mxu0 %vm4977_vm0, %v4976_v42 }
 0x216   :  { %4654 = vmatprep.subr.mxu0 %v4976_v42 }
 0x21c   :  { %v1382_v55 = vpop.f32.mrb[8].mxu1  ;;  %4652 = vmatmul.mubr.f32.vlgmr.msra.gmra.mrb[10].mxu0 %v5240_v30 }
 0x21d   :  { %v4820_v57 = vadd.f32 %v1382_v55, %v5237_v28  ;;  %4655 = vmatpush3.msra.mxu0 %v1401_v44  ;;  %v4638_v58 = vpop.f32.mrb[9].mxu1  ;;  %4656 = vmatprep.mubr.msk.f32.mxu0 %vm4977_vm0, %v4976_v42 }
 0x21e   :  { %4659 = vmatprep.subr.mxu0 %v4976_v42 }
 0x21f   :  { %v1386_v59 = vadd.f32 3.0, %v4820_v57 }
 0x221   :  { %v1387_v62 = vmax.f32 %v1386_v59, 0.0 }
 0x223   :  { %v1388_v0 = vmin.f32 %v1387_v62, 6.0 }
 0x224   :  { %4657 = vmatmul.mubr.f32.vlgmr.msra.gmra.mrb[10].mxu0 %v5244_v34 }
 0x225   :  { %v1389_v4 = vmul.f32 0.16666667, %v1388_v0  ;;  %4660 = vmatpush3.msra.mxu0 %v1479_v46  ;;  %4661 = vmatprep.mubr.msk.f32.mxu0 %vm4977_vm0, %v4976_v42 }
 0x226   :  { %4664 = vmatprep.subr.mxu0 %v4976_v42 }
 0x227   :  { %v1390_v63 = vmul.f32 %v4820_v57, %v1389_v4  ;;  %v4955_v57 = vld [vmem:[%s5470_s4] ss:$8 sps:$4 sm:$0xff]  }
 0x229   :  { %v1861_v7 = vand.u32 4294901760, %v1390_v63 }
 0x22b   :  { %v1938_v8 = vsub.f32 %v1390_v63, %v1861_v7  ;;  %4670 = vmatpush3.msra.mxu1 %v1861_v7 }
 0x22c   :  { %4662 = vmatmul.mubr.f32.vlgmr.msra.gmra.mrb[10].mxu0 %v5235_v27  ;;  %4672 = vmatmul.mubr.f32.vlgmr.msra.gmra.mrb[10].mxu1 %v5289_v6 }
 0x22d   :  { %v1939_v10 = vand.u32 4294901760, %v1938_v8  ;;  %4665 = vmatpush3.msra.mxu0 %v1401_v44  ;;  %4674 = vmatprep.subr.mxu1 %v4976_v42 }
 0x22e   :  { %4666 = vmatprep.mubr.msk.f32.mxu0 %vm4977_vm0, %v4976_v42  ;;  %4676 = vmatprep.mubr.msk.f32.mxu1 %vm4977_vm0, %v4976_v42 }
 0x22f   :  { %v1940_v11 = vsub.f32 %v1938_v8, %v1939_v10  ;;  %4699 = vmatprep.subr.mxu0 %v4976_v42 }
 0x231   :  { %v1941_v13 = vand.u32 4294901760, %v1940_v11 }
 0x233   :  { %4675 = vmatpush3.msra.mxu1 %v1941_v13 }
 0x234   :  { %4667 = vmatmul.mubr.f32.vlgmr.msra.gmra.mrb[10].mxu0 %v5235_v27  ;;  %4677 = vmatmul.mubr.f32.vlgmr.msra.gmra.mrb[10].mxu1 %v5266_v54 }
 0x235   :  { %4679 = vmatprep.subr.mxu1 %v4976_v42  ;;  %4700 = vmatpush3.msra.mxu0 %v5287_v5 }
 0x236   :  { %4680 = vmatpush3.msra.mxu1 %v1938_v8  ;;  %4701 = vmatprep.mubr.msk.f32.mxu0 %vm4977_vm0, %v4976_v42 }
 0x237   :  { %4704 = vmatprep.subr.mxu0 %v4976_v42  ;;  %4681 = vmatprep.mubr.msk.f32.mxu1 %vm4977_vm0, %v4976_v42 }
 0x238   :  { %4702 = vmatmul.mubr.f32.vlgmr.msra.gmra.mrb[12].mxu0 %v5177_v1  ;;  %4684 = vmatprep.subr.mxu1 %v4976_v42 }
 0x239   :  { %4705 = vmatpush3.msra.mxu0 %v2396_v15  ;;  %4706 = vmatprep.mubr.msk.f32.mxu0 %vm4977_vm0, %v4976_v42 }
 0x23a   :  { %4709 = vmatprep.subr.mxu0 %v4976_v42 }
 0x23c   :  { %4682 = vmatmul.mubr.f32.vlgmr.msra.gmra.mrb[10].mxu1 %v5270_v56 }
 0x23d   :  { %4685 = vmatpush3.msra.mxu1 %v1861_v7  ;;  %4686 = vmatprep.mubr.msk.f32.mxu1 %vm4977_vm0, %v4976_v42 }
 0x23e   :  { %4689 = vmatprep.subr.mxu1 %v4976_v42 }
 0x240   :  { %4707 = vmatmul.mubr.f32.vlgmr.msra.gmra.mrb[12].mxu0 %v5163_v48 }
 0x241   :  { %4710 = vmatpush3.msra.mxu0 %v2393_v9  ;;  %4711 = vmatprep.mubr.msk.f32.mxu0 %vm4977_vm0, %v4976_v42 }
 0x242   :  { %4714 = vmatprep.subr.mxu0 %v4976_v42 }
 0x244   :  { %4687 = vmatmul.mubr.f32.vlgmr.msra.gmra.mrb[10].mxu1 %v5278_v61 }
 0x245   :  { %4690 = vmatpush3.msra.mxu1 %v1939_v10  ;;  %4691 = vmatprep.mubr.msk.f32.mxu1 %vm4977_vm0, %v4976_v42 }
 0x246   :  { %4694 = vmatprep.subr.mxu1 %v4976_v42 }
 0x248   :  { %4712 = vmatmul.mubr.f32.vlgmr.msra.gmra.mrb[12].mxu0 %v5166_v49 }
 0x249   :  { %4715 = vmatpush3.msra.mxu0 %v5287_v5  ;;  %4716 = vmatprep.mubr.msk.f32.mxu0 %vm4977_vm0, %v4976_v42 }
 0x24a   :  { %4719 = vmatprep.subr.mxu0 %v4976_v42 }
 0x24c   :  { %4692 = vmatmul.mubr.f32.vlgmr.msra.gmra.mrb[10].mxu1 %v5266_v54 }
 0x24d   :  { %4695 = vmatpush3.msra.mxu1 %v1861_v7  ;;  %4696 = vmatprep.mubr.msk.f32.mxu1 %vm4977_vm0, %v4976_v42 }
 0x24e   :  { %4729 = vmatprep.subr.mxu1 %v4976_v42 }
 0x250   :  { %4717 = vmatmul.mubr.f32.vlgmr.msra.gmra.mrb[12].mxu0 %v5169_v52 }
 0x251   :  { %4720 = vmatpush3.msra.mxu0 %v2394_v12  ;;  %4721 = vmatprep.mubr.msk.f32.mxu0 %vm4977_vm0, %v4976_v42 }
 0x252   :  { %4724 = vmatprep.subr.mxu0 %v4976_v42 }
 0x254   :  { %4697 = vmatmul.mubr.f32.vlgmr.msra.gmra.mrb[10].mxu1 %v5266_v54 }
 0x255   :  { %4730 = vmatpush3.msra.mxu1 %v2770_v19  ;;  %4731 = vmatprep.mubr.msk.f32.mxu1 %vm4977_vm0, %v4976_v42 }
 0x256   :  { %4734 = vmatprep.subr.mxu1 %v4976_v42 }
 0x258   :  { %4722 = vmatmul.mubr.f32.vlgmr.msra.gmra.mrb[12].mxu0 %v5163_v48  ;;  %4732 = vmatmul.mubr.f32.vlgmr.msra.gmra.mrb[12].mxu1 %v5177_v1 }
 0x259   :  { %4725 = vmatpush3.msra.mxu0 %v5287_v5  ;;  %4735 = vmatpush3.msra.mxu1 %v2850_v22  ;;  %v1855_v5 = vpop.permute.xlu1 %1854 }
 0x25a   :  { %4726 = vmatprep.mubr.msk.f32.mxu0 %vm4977_vm0, %v4976_v42  ;;  %4736 = vmatprep.mubr.msk.f32.mxu1 %vm4977_vm0, %v4976_v42 }
 0x25b   :  { %4739 = vmatprep.subr.mxu1 %v4976_v42  ;;  %4759 = vmatprep.subr.mxu0 %v4976_v42 }
 0x260   :  { %4727 = vmatmul.mubr.f32.vlgmr.msra.gmra.mrb[12].mxu0 %v5163_v48  ;;  %4737 = vmatmul.mubr.f32.vlgmr.msra.gmra.mrb[12].mxu1 %v5163_v48 }
 0x261   :  { %4740 = vmatpush3.msra.mxu1 %v2847_v18  ;;  %4741 = vmatprep.mubr.msk.f32.mxu1 %vm4977_vm0, %v4976_v42 }
 0x262   :  { %4744 = vmatprep.subr.mxu1 %v4976_v42  ;;  %4761 = vmatprep.mubr.msk.f32.mxu0 %vm4977_vm0, %v4976_v42 }
 0x268   :  { %4742 = vmatmul.mubr.f32.vlgmr.msra.gmra.mrb[12].mxu1 %v5166_v49 }
 0x269   :  { %4745 = vmatpush3.msra.mxu1 %v2770_v19  ;;  %4746 = vmatprep.mubr.msk.f32.mxu1 %vm4977_vm0, %v4976_v42 }
 0x26a   :  { %4749 = vmatprep.subr.mxu1 %v4976_v42 }
 0x270   :  { %4747 = vmatmul.mubr.f32.vlgmr.msra.gmra.mrb[12].mxu1 %v5169_v52 }
 0x271   :  { %4750 = vmatpush3.msra.mxu1 %v2848_v20  ;;  %4751 = vmatprep.mubr.msk.f32.mxu1 %vm4977_vm0, %v4976_v42 }
 0x272   :  { %4754 = vmatprep.subr.mxu1 %v4976_v42 }
 0x278   :  { %4752 = vmatmul.mubr.f32.vlgmr.msra.gmra.mrb[12].mxu1 %v5163_v48 }
 0x279   :  { %4755 = vmatpush3.msra.mxu1 %v2770_v19  ;;  %4756 = vmatprep.mubr.msk.f32.mxu1 %vm4977_vm0, %v4976_v42 }
 0x27a   :  { %4789 = vmatprep.subr.mxu1 %v4976_v42 }
 0x280   :  { %4757 = vmatmul.mubr.f32.vlgmr.msra.gmra.mrb[12].mxu1 %v5163_v48 }
 0x281   :  { %4791 = vmatprep.mubr.msk.f32.mxu1 %vm4977_vm0, %v4976_v42 }
 0x307   :  { %v5376_v49 = vpop.f32.mrb[10].mxu0 }
 0x308   :  { %v4668_v52 = vpop.f32.mrb[11].mxu0 }
 0x327   :  { %v5378_v1 = vpop.f32.mrb[10].mxu1 }
 0x328   :  { %v4698_v23 = vpop.f32.mrb[11].mxu1 }
 0x333   :  { %v2757_v24 = vpop.f32.mrb[12].mxu0 }
 0x334   :  { %v4823_v25 = vadd.f32 %v2757_v24, %v5237_v28  ;;  %v4728_v26 = vpop.f32.mrb[13].mxu0 }
 0x336   :  { %v2761_v29 = vadd.f32 3.0, %v4823_v25 }
 0x338   :  { %v2762_v31 = vmax.f32 %v2761_v29, 0.0 }
 0x33a   :  { %v2763_v32 = vmin.f32 %v2762_v31, 6.0 }
 0x33c   :  { %v2764_v33 = vmul.f32 0.16666667, %v2763_v32 }
 0x33e   :  { %v2765_v35 = vmul.f32 %v4823_v25, %v2764_v33 }
 0x340   :  { %v3221_v36 = vand.u32 4294901760, %v2765_v35 }
 0x342   :  { %v3298_v48 = vsub.f32 %v2765_v35, %v3221_v36  ;;  %4760 = vmatpush3.msra.mxu0 %v3221_v36 }
 0x343   :  { %4762 = vmatmul.mubr.f32.vlgmr.msra.gmra.mrb[14].mxu0 %v5251_v41  ;;  %4764 = vmatprep.subr.mxu0 %v4976_v42 }
 0x344   :  { %v3299_v37 = vand.u32 4294901760, %v3298_v48  ;;  %4766 = vmatprep.mubr.msk.f32.mxu0 %vm4977_vm0, %v4976_v42 }
 0x346   :  { %v3300_v38 = vsub.f32 %v3298_v48, %v3299_v37 }
 0x348   :  { %v3301_v39 = vand.u32 4294901760, %v3300_v38  ;;  %v4975_v38 = vld [vmem:[%s5461_s0 + $0x8] sm:$0xff] }
 0x34a   :  { %4765 = vmatpush3.msra.mxu0 %v3301_v39 }
 0x34b   :  { %4767 = vmatmul.mubr.f32.vlgmr.msra.gmra.mrb[14].mxu0 %v5235_v27  ;;  %4769 = vmatprep.subr.mxu0 %v4976_v42 }
 0x34c   :  { %4770 = vmatpush3.msra.mxu0 %v3298_v48  ;;  %4771 = vmatprep.mubr.msk.f32.mxu0 %vm4977_vm0, %v4976_v42  ;;  %v4974_v48 = vld [vmem:[%s5461_s0] sm:$0xff] }
 0x34d   :  { %4774 = vmatprep.subr.mxu0 %v4976_v42 }
 0x353   :  { %v3211_v40 = vpop.f32.mrb[12].mxu1  ;;  %4772 = vmatmul.mubr.f32.vlgmr.msra.gmra.mrb[14].mxu0 %v5240_v30 }
 0x354   :  { %v4824_v41 = vadd.f32 %v3211_v40, %v5237_v28  ;;  %4775 = vmatpush3.msra.mxu0 %v3221_v36  ;;  %v4758_v44 = vpop.f32.mrb[13].mxu1  ;;  %4776 = vmatprep.mubr.msk.f32.mxu0 %vm4977_vm0, %v4976_v42 }
 0x355   :  { %4779 = vmatprep.subr.mxu0 %v4976_v42 }
 0x356   :  { %v3215_v45 = vadd.f32 3.0, %v4824_v41 }
 0x358   :  { %v3216_v46 = vmax.f32 %v3215_v45, 0.0 }
 0x35a   :  { %v3217_v47 = vmin.f32 %v3216_v46, 6.0 }
 0x35b   :  { %4777 = vmatmul.mubr.f32.vlgmr.msra.gmra.mrb[14].mxu0 %v5244_v34 }
 0x35c   :  { %v3218_v50 = vmul.f32 0.16666667, %v3217_v47  ;;  %4780 = vmatpush3.msra.mxu0 %v3299_v37  ;;  %4781 = vmatprep.mubr.msk.f32.mxu0 %vm4977_vm0, %v4976_v42 }
 0x35d   :  { %4784 = vmatprep.subr.mxu0 %v4976_v42 }
 0x35e   :  { %v3219_v28 = vmul.f32 %v4824_v41, %v3218_v50 }
 0x360   :  { %v3673_v30 = vand.u32 4294901760, %v3219_v28 }
 0x362   :  { %v3750_v51 = vsub.f32 %v3219_v28, %v3673_v30  ;;  %4790 = vmatpush3.msra.mxu1 %v3673_v30 }
 0x363   :  { %4782 = vmatmul.mubr.f32.vlgmr.msra.gmra.mrb[14].mxu0 %v5235_v27  ;;  %4792 = vmatmul.mubr.f32.vlgmr.msra.gmra.mrb[14].mxu1 %v5289_v6  ;;  %v4822_v6 = vadd.f32 %v5378_v1, %v1855_v5 }
 0x364   :  { %v3751_v53 = vand.u32 4294901760, %v3750_v51  ;;  %4785 = vmatpush3.msra.mxu0 %v3221_v36  ;;  %4794 = vmatprep.subr.mxu1 %v4976_v42 }
 0x365   :  { %4786 = vmatprep.mubr.msk.f32.mxu0 %vm4977_vm0, %v4976_v42  ;;  %4796 = vmatprep.mubr.msk.f32.mxu1 %vm4977_vm0, %v4976_v42  ;;  %v4384_v10 = vmul.f32 -1.442695, %v4822_v6 }
 0x366   :  { %v3752_v34 = vsub.f32 %v3750_v51, %v3751_v53 }
 0x368   :  { %v3753_v55 = vand.u32 4294901760, %v3752_v34 }
 0x36a   :  { %4795 = vmatpush3.msra.mxu1 %v3753_v55 }
 0x36b   :  { %4787 = vmatmul.mubr.f32.vlgmr.msra.gmra.mrb[14].mxu0 %v5235_v27  ;;  %4797 = vmatmul.mubr.f32.vlgmr.msra.gmra.mrb[14].mxu1 %v5266_v54  ;;  %v4954_v27 = vld [vmem:[%s5469_s3 + $0x4] ss:$8 sps:$4 sm:$0xff]  }
 0x36c   :  { %4799 = vmatprep.subr.mxu1 %v4976_v42  ;;  %4801 = vmatprep.mubr.msk.f32.mxu1 %vm4977_vm0, %v4976_v42 }
 0x36d   :  { %4800 = vmatpush3.msra.mxu1 %v3750_v51  ;;  %4184 = vmatprep.mubr.bf16.mxu0 %v4978_v43 }
 0x36e   :  { %4804 = vmatprep.subr.mxu1 %v4976_v42  ;;  %4152 = vmatprep.subr.bf16.mxu0 %v4954_v27 }
 0x373   :  { %4802 = vmatmul.mubr.f32.vlgmr.msra.gmra.mrb[14].mxu1 %v5270_v56  ;;  %v4952_v56 = vld [vmem:[%s5469_s3] ss:$8 sps:$4 sm:$0xff]  }
 0x374   :  { %4805 = vmatpush3.msra.mxu1 %v3673_v30  ;;  %4806 = vmatprep.mubr.msk.f32.mxu1 %vm4977_vm0, %v4976_v42 }
 0x375   :  { %4809 = vmatprep.subr.mxu1 %v4976_v42  ;;  %4153 = vmatpush1.bf16.msra.mxu0 %v4952_v56 }
 0x376   :  { %4196 = vmatprep.subr.bf16.mxu0 %v4954_v27 }
 0x37b   :  { %4807 = vmatmul.mubr.f32.vlgmr.msra.gmra.mrb[14].mxu1 %v5278_v61 }
 0x37c   :  { %4810 = vmatpush3.msra.mxu1 %v3751_v53  ;;  %4811 = vmatprep.mubr.msk.f32.mxu1 %vm4977_vm0, %v4976_v42 }
 0x37d   :  { %4814 = vmatprep.subr.mxu1 %v4976_v42 }
 0x383   :  { %4812 = vmatmul.mubr.f32.vlgmr.msra.gmra.mrb[14].mxu1 %v5266_v54 }
 0x384   :  { %4815 = vmatpush3.msra.mxu1 %v3673_v30  ;;  %4816 = vmatprep.mubr.msk.f32.mxu1 %vm4977_vm0, %v4976_v42  ;;  %v4957_v42 = vld [vmem:[%s5470_s4 + $0x4] ss:$8 sps:$4 sm:$0xff]  }
 0x385   :  { %4256 = vmatprep.subr.bf16.mxu1 %v4957_v42 }
 0x38b   :  { %4817 = vmatmul.mubr.f32.vlgmr.msra.gmra.mrb[14].mxu1 %v5266_v54  ;;  %v1394_v54 = vpop.permute.xlu0 %1393 }
 0x38c   :  { %4288 = vmatprep.mubr.bf16.mxu1 %v4978_v43  ;;  %4257 = vmatpush1.bf16.msra.mxu1 %v4955_v57  ;;  %v4821_v58 = vadd.f32 %v5376_v49, %v1394_v54 }
 0x38d   :  { %4300 = vmatprep.subr.bf16.mxu1 %v4957_v42 }
 0x38e   :  { %v4383_v59 = vmul.f32 -1.442695, %v4821_v58 }
 0x390   :  { %4958 = vpow2.f32 %v4383_v59 }
 0x39a   :  { %v4959_v2 = vpop.eup %4958 }
 0x39b   :  { %v1849_v4 = vadd.f32 1.0, %v4959_v2 }
 0x43e   :  { %v3662_v60 = vpop.f32.mrb[14].mxu0 }
 0x43f   :  { %v4825_v61 = vadd.f32 %v3662_v60, %v1394_v54  ;;  %v4788_v62 = vpop.f32.mrb[15].mxu0 }
 0x441   :  { %v4385_v0 = vmul.f32 -1.442695, %v4825_v61 }
 0x443   :  { %4960 = vpow2.f32 %v4385_v0 }
 0x44d   :  { %v4961_v3 = vpop.eup %4960 }
 0x44e   :  { %v3669_v63 = vadd.f32 1.0, %v4961_v3 }
 0x450   :  { %4962 = vrcp.f32 %v3669_v63 }
 0x451   :  { %4964 = vrcp.f32 %v1849_v4 }
 0x452   :  { %4966 = vpow2.f32 %v4384_v10 }
 0x45a   :  { %v4963_v7 = vpop.eup %4962 }
 0x45b   :  { %v4125_v8 = vrot.slane %v4963_v7, 4  ;;  %v4965_v9 = vpop.eup %4964 }
 0x45c   :  { %v4967_v20 = vpop.eup %4966 }
 0x45d   :  { %v4127_v11 = vsel %vm482_vm2, %v4965_v9, %v4125_v8  ;;  %v2309_v22 = vadd.f32 1.0, %v4967_v20 }
 0x45e   :  { %v4134_v12 = vpack.c.bf16 %v4127_v11, %v4127_v11  ;;  %v4114_v13 = vpop.f32.mrb[14].mxu1 }
 0x45f   :  { %v4826_v14 = vadd.f32 %v4114_v13, %v1855_v5  ;;  %v4818_v15 = vpop.f32.mrb[15].mxu1 }
 0x460   :  { %v4135_v16 = vunpack.c.l.bf16 %v4134_v12 }
 0x461   :  { %v4386_v17 = vmul.f32 -1.442695, %v4826_v14 }
 0x462   :  { %v4136_v19 = vsub.f32 %v4127_v11, %v4135_v16 }
 0x463   :  { %4968 = vpow2.f32 %v4386_v17 }
 0x464   :  { %v4137_v18 = vpack.c.bf16 %v4136_v19, %v4136_v19 }
 0x466   :  { %4389 = vmatmul.mubr.msk.bf16.vlgmr.msra.gmra.mrb[16].mxu0 %vm4148_vm4, %v4137_v18 }
 0x467   :  { %4197 = vmatpush1.bf16.msra.mxu0 %v4952_v56  ;;  %4228 = vmatprep.mubr.bf16.mxu0 %v4978_v43 }
 0x46d   :  { %v4969_v21 = vpop.eup %4968 }
 0x46e   :  { %v4121_v49 = vadd.f32 1.0, %v4969_v21 }
 0x470   :  { %4970 = vrcp.f32 %v4121_v49 }
 0x471   :  { %4972 = vrcp.f32 %v2309_v22 }
 0x472   :  { %4390 = vmatmul.mubr.msk.bf16.vlgmr.msra.gmra.mrb[16].mxu0 %vm4148_vm4, %v4134_v12 }
 0x47a   :  { %v4971_v52 = vpop.eup %4970 }
 0x47b   :  { %v4129_v1 = vrot.slane %v4971_v52, 4  ;;  %v4973_v23 = vpop.eup %4972 }
 0x47d   :  { %v4131_v24 = vsel %vm482_vm2, %v4973_v23, %v4129_v1 }
 0x47e   :  { %v4239_v25 = vpack.c.bf16 %v4131_v24, %v4131_v24 }
 0x480   :  { %v4240_v26 = vunpack.c.l.bf16 %v4239_v25 }
 0x482   :  { %v4241_v29 = vsub.f32 %v4131_v24, %v4240_v26 }
 0x484   :  { %v4242_v31 = vpack.c.bf16 %v4241_v29, %v4241_v29 }
 0x486   :  { %4393 = vmatmul.mubr.msk.bf16.vlgmr.msra.gmra.mrb[16].mxu1 %vm4148_vm4, %v4242_v31 }
 0x487   :  { %4301 = vmatpush1.bf16.msra.mxu1 %v4955_v57  ;;  %4332 = vmatprep.mubr.bf16.mxu1 %v4978_v43 }
 0x492   :  { %4394 = vmatmul.mubr.msk.bf16.vlgmr.msra.gmra.mrb[16].mxu1 %vm4148_vm4, %v4239_v25 }
 0x545   :  { %v4230_v32 = vpop.f32.mrb[16].mxu0 }
 0x546   :  { %v4232_v33 = vpop.f32.mrb[17].mxu0  ;;  %v4341_v37 = vmul.f32 %v4974_v48, %v4230_v32 }
 0x547   :  { %v4234_v35 = vpop.f32.mrb[18].mxu0  ;;  %v4342_v39 = vmul.f32 %v4975_v38, %v4232_v33 }
 0x548   :  { %v4235_v36 = vpop.f32.mrb[19].mxu0 }
 0x565   :  { %v4334_v40 = vpop.f32.mrb[16].mxu1 }
 0x566   :  { %v4343_v41 = vmul.f32 %v4341_v37, %v4334_v40  ;;  %v4336_v44 = vpop.f32.mrb[17].mxu1 }
 0x567   :  { %v4344_v43 = vmul.f32 %v4342_v39, %v4336_v44  ;;  %v4338_v45 = vpop.f32.mrb[18].mxu1 }
 0x568   :  { %4345 = vst [vmem:[%s5471_s11] sm:$0xff] %v4343_v41  ;;  %v4339_v46 = vpop.f32.mrb[19].mxu1 }
 0x569   :  { %4346 = vst [vmem:[%s5471_s11 + $0x8] sm:$0xff] %v4344_v43 }

</bundles_post_ra>
